<compile_context>
chip_gen: v5e
topology: v5e:2x2
jax: 0.10.0
libtpu: 0.0.40
codegen_flags: <defaults>
</compile_context>

<pallas_src>
import functools

import jax
import jax.numpy as jnp
from jax import lax
from jax.experimental import pallas as pl
from jax.experimental.pallas import tpu as pltpu


# ----------------------------- forward kernel ------------------------------
def _dense_relu_fwd_kernel(x_ref, wt_ref, b_ref, o_ref):
    z = jnp.dot(x_ref[...], wt_ref[...], preferred_element_type=jnp.float32)
    z = z + b_ref[...]
    o_ref[...] = jnp.maximum(z, 0.0)


def dense_relu_forward(x, w, bias):
    """forward(x) = relu(x @ W^T + bias); x:[B,Din], w:[Dout,Din], bias:[Dout].

    Single-block spec (toy sizes). TODO(synk): tile (B, Dout) with a streamed K
    axis + f32 accumulator for production shapes (v7x VMEM is only 64 MiB).
    """
    B, Din = x.shape
    Dout = w.shape[0]
    wt = w.T                       # [Din, Dout]
    bias2 = bias.reshape(1, Dout)  # 2-D for TPU layout
    return pl.pallas_call(
        _dense_relu_fwd_kernel,
        out_shape=jax.ShapeDtypeStruct((B, Dout), jnp.float32),
        in_specs=[
            pl.BlockSpec((B, Din), lambda: (0, 0)),
            pl.BlockSpec((Din, Dout), lambda: (0, 0)),
            pl.BlockSpec((1, Dout), lambda: (0, 0)),
        ],
        out_specs=pl.BlockSpec((B, Dout), lambda: (0, 0)),
    )(x, wt, bias2)


# --------------------------- attribution kernel ----------------------------
def _smoothgrad_kernel(x_ref, noise_ref, wt_ref, b_ref, out_ref,
                       z0_ref, accm_ref, *, std, inv_niter):
    n = pl.program_id(0)
    T, B, Din = noise_ref.shape
    Dout = wt_ref.shape[1]

    @pl.when(n == 0)
    def _():
        # z0 = x @ Wt + bias, computed once (affine layer is linear in the noise).
        z0_ref[...] = (
            jnp.dot(x_ref[...], wt_ref[...], preferred_element_type=jnp.float32)
            + b_ref[...]
        )
        accm_ref[...] = jnp.zeros_like(accm_ref)

    # Batched forward over T SmoothGrad samples: one (T*B, Din) @ (Din, Dout)
    # MXU matmul per grid step instead of T tiny ones.
    nz = jnp.dot(
        noise_ref[...].reshape(T * B, Din), wt_ref[...],
        preferred_element_type=jnp.float32,
    ).reshape(T, B, Dout)
    z = z0_ref[...] + std * nz                      # [T, B, Dout]
    mask = (z > 0.0).astype(jnp.float32)            # d relu / d z
    accm_ref[...] += mask.sum(axis=0)               # running sum of masks [B, Dout]

    @pl.when(n == pl.num_programs(0) - 1)
    def _():
        # accu = (sum_n mask_n / niter) @ W, with W expressed via Wt [Din, Dout]
        # by contracting Dout on both operands (no transpose materialized).
        out_ref[...] = lax.dot_general(
            accm_ref[...] * inv_niter, wt_ref[...],
            dimension_numbers=(((1,), (1,)), ((), ())),
            preferred_element_type=jnp.float32,
        )


def smoothgrad_attribution(x, w, bias, noise, *, std=1.0, niter=50,
                           samples_per_step=None):
    """SmoothGradAttributor.attribution() for the Dense+ReLU base.

    x:     [B, Din]        stored input (self._in)
    w:     [Dout, Din]     base-module weight (PyTorch layout)
    bias:  [Dout]          base-module bias
    noise: [niter, B, Din] standard-normal draws (one per SmoothGrad sample)
    """
    B, Din = x.shape
    Dout = w.shape[0]
    assert noise.shape == (niter, B, Din)
    wt = w.T                       # [Din, Dout]; resident in VMEM
    bias2 = bias.reshape(1, Dout)

    if samples_per_step is None:
        # Largest divisor of niter whose noise block stays under ~4 MiB
        # (double-buffered by the pipeline, so well inside the scoped VMEM limit).
        budget = 4 * 1024 * 1024
        samples_per_step = 1
        for t in range(niter, 0, -1):
            if niter % t == 0 and t * B * Din * 4 <= budget:
                samples_per_step = t
                break
    T = samples_per_step
    assert niter % T == 0
    steps = niter // T

    kernel = functools.partial(
        _smoothgrad_kernel, std=float(std), inv_niter=1.0 / float(niter)
    )

    return pl.pallas_call(
        kernel,
        out_shape=jax.ShapeDtypeStruct((B, Din), jnp.float32),
        grid_spec=pltpu.PrefetchScalarGridSpec(
            num_scalar_prefetch=0,
            grid=(steps,),
            in_specs=[
                pl.BlockSpec((B, Din), lambda n: (0, 0)),        # x (resident)
                pl.BlockSpec((T, B, Din), lambda n: (n, 0, 0)),  # T noise samples
                pl.BlockSpec((Din, Dout), lambda n: (0, 0)),     # Wt (resident)
                pl.BlockSpec((1, Dout), lambda n: (0, 0)),       # bias (resident)
            ],
            out_specs=pl.BlockSpec((B, Din), lambda n: (0, 0)),  # written once
            scratch_shapes=[
                pltpu.VMEM((B, Dout), jnp.float32),  # z0 = x @ Wt + bias
                pltpu.VMEM((B, Dout), jnp.float32),  # mask accumulator
            ],
        ),
        compiler_params=pltpu.CompilerParams(
            # Reduction over SmoothGrad sample blocks (accumulator is carried).
            dimension_semantics=("arbitrary",),
        ),
    )(x, noise, wt, bias2)


# --------------------------------- main ------------------------------------
if __name__ == "__main__":
    B, Din, Dout = 8, 32, 16
    std, niter = 1.0, 8

    key = jax.random.PRNGKey(0)
    kx, kw, kb, kn = jax.random.split(key, 4)

    # Deterministic synthetic parameters for the Dense+ReLU base module.
    x = jax.random.normal(kx, (B, Din), dtype=jnp.float32)
    w = 0.1 * jax.random.normal(kw, (Dout, Din), dtype=jnp.float32)
    bias = 0.1 * jax.random.normal(kb, (Dout,), dtype=jnp.float32)
    noise = jax.random.normal(kn, (niter, B, Din), dtype=jnp.float32)

    # forward pass (semantics = base forward)
    y = dense_relu_forward(x, w, bias)
    jax.block_until_ready(y)

    # SmoothGrad attribution via the Pallas kernel.
    accu = smoothgrad_attribution(x, w, bias, noise, std=std, niter=niter)
    jax.block_until_ready(accu)

    # Pure-JAX reference (autograd over the same noisy samples).
    wt = w.T

    def fwd_sum(b):
        return jnp.sum(jnp.maximum(b @ wt + bias, 0.0))

    def grad_one(noise_n):
        return jax.grad(fwd_sum)(x + std * noise_n)

    ref = jnp.mean(jax.vmap(grad_one)(noise), axis=0)

    assert accu.shape == x.shape and accu.dtype == x.dtype
    assert jnp.allclose(accu, ref, atol=1e-5, rtol=1e-5), "mismatch vs autograd reference"

    # Also sanity-check the forward against plain JAX.
    assert jnp.allclose(y, jnp.maximum(x @ wt + bias, 0.0), atol=1e-5, rtol=1e-5)

    print("KERNEL_OK")
</pallas_src>

<mosaic_0001>
module attributes {stable_mosaic.version = 11 : i64} {
  func.func @_dense_relu_fwd_kernel(%arg0: memref<8x32xf32, #tpu.memory_space<vmem>>, %arg1: memref<32x16xf32, #tpu.memory_space<vmem>>, %arg2: memref<1x16xf32, #tpu.memory_space<vmem>>, %arg3: memref<8x16xf32, #tpu.memory_space<vmem>>) attributes {dimension_semantics = [], scalar_prefetch = 0 : i64, scratch_operands = 0 : i64, tpu.core_type = #tpu.core_type<tc>} {
    %c0 = arith.constant 0 : index
    %c0_0 = arith.constant 0 : index
    %0 = vector.load %arg0[%c0, %c0_0] : memref<8x32xf32, #tpu.memory_space<vmem>>, vector<8x32xf32>
    %c0_1 = arith.constant 0 : index
    %c0_2 = arith.constant 0 : index
    %1 = vector.load %arg1[%c0_1, %c0_2] : memref<32x16xf32, #tpu.memory_space<vmem>>, vector<32x16xf32>
    %cst = arith.constant dense<0.000000e+00> : vector<8x16xf32>
    %2 = tpu.matmul %0, %1, %cst {dimension_numbers = #tpu.dot_dimension_numbers<[1], [0], [0], [1], [0, 0, 1, 1], [], []>} : vector<8x32xf32>, vector<32x16xf32>, vector<8x16xf32> -> vector<8x16xf32>
    %c0_3 = arith.constant 0 : index
    %c0_4 = arith.constant 0 : index
    %3 = vector.load %arg2[%c0_3, %c0_4] : memref<1x16xf32, #tpu.memory_space<vmem>>, vector<1x16xf32>
    %4 = vector.broadcast %3 : vector<1x16xf32> to vector<8x16xf32>
    %5 = arith.addf %2, %4 : vector<8x16xf32>
    %cst_5 = arith.constant 0.000000e+00 : f32
    %6 = vector.broadcast %cst_5 : f32 to vector<8x16xf32>
    %7 = arith.maximumf %5, %6 : vector<8x16xf32>
    %c0_6 = arith.constant 0 : index
    %c0_7 = arith.constant 0 : index
    %8 = vector.load %arg3[%c0_6, %c0_7] : memref<8x16xf32, #tpu.memory_space<vmem>>, vector<8x16xf32>
    tpu.vector_store %arg3[%c0_6, %c0_7], %7 {strides = array<i32>} : memref<8x16xf32, #tpu.memory_space<vmem>>, vector<8x16xf32>,
    return
  }
}

</mosaic_0001>

<bundles_post_ra>
// kernel: tpu_custom_call.1
= control target key start
LH: loop header
LB: loop body
LE: loop exit
PB: predicated region body
PF: predicated region fallthrough
CT: control target
= control target key end

     0   :  { %s138_s0 = inlined_call_operand.vmem [shape: f32[8,32], index: 0, kind: input, shape index: {}]   ;;  %s139_s1 = inlined_call_operand.vmem [shape: f32[32,16], index: 1, kind: input, shape index: {}]   ;;  %s140_s2 = inlined_call_operand.vmem [shape: f32[1,16], index: 2, kind: input, shape index: {}]   ;;  %s141_s3 = inlined_call_operand.hbm [shape: f32[8,16], index: 3, kind: output, shape index: {}]  }
   0x1   :  { %v19_v0 = vld [vmem:[%s139_s1 + $0x18] sm:$0xff]  ;;  %v18_v1 = vld [vmem:[%s139_s1 + $0x10] sm:$0xff]  ;;  %v17_v2 = vld [vmem:[%s139_s1 + $0x8] sm:$0xff] }
   0x2   :  { %40 = vmatpush.msra.mxu0 %v19_v0 }
   0x3   :  { %8 = vsyncpa [#allocation3], 0  ;;  %v16_v3 = vld [vmem:[%s139_s1] sm:$0xff]  ;;  %vm24_vm0 = vcmask 261120   ;;  %s96_s24 = smov [#allocation2]   ;;  %s58_s28 = sshll.u32 %s141_s3, 4  ;;  %s59_s28 = int_to_ptr.hbm [resolvable:$true] %s58_s28 }
   0x4   :  { %41 = vmatpush.msra.mxu0 %v18_v1  ;;  %v15_v4 = vld [vmem:[%s138_s0] sm:$0xff]  ;;  %s56_s25 = sshll.u32 %s96_s24, 4  ;;  %vm49_vm1 = vcmask 130048   ;;  %s57_s25 = int_to_ptr.vmem [resolvable:$true] %s56_s25 }
   0x5   :  { %v69_v5 = vld [vmem:[%s140_s2] ss:$0 sm:$0xff] }
   0x6   :  { %42 = vmatpush.msra.mxu0 %v17_v2 }
   0x8   :  { %43 = vmatpush.msra.mxu0 %v16_v3 }
   0x9   :  { %67 = vmatmul.msk.f32.vlgmr.msra.gmra.mxu0 %vm24_vm0, %v15_v4 }
  0x86   :  { %v45_v6 = vpop.f32.mrf.mxu0 }
  0x87   :  { %v46_v7 = vadd.f32 %v69_v5, %v45_v6 }
  0x89   :  { %v48_v8 = vmax.f32 %v46_v7, 0.0 }
  0x8b   :  { %50 = vst.msk [vmem:[#allocation2] sm:$0xff] %vm49_vm1, %v48_v8 }
  0x8c   :  { %61 = dma.vmem_to_hbm [thread:$0]  %s57_s25, 128, %s59_s28, [#allocation3]  }
  0x8d   :  { %94 = dma.done.wait [#allocation3], 128  }
  0x8e   :  { %95 = vsyncadd [#allocation3], 4294967168 }
  0x8f   :  { %66 = vsyncpa [#allocation3], 1 }

</bundles_post_ra>
